<compile_context>
chip_gen: v7x
topology: tpu7x:2x2x1
jax: 0.10.0
libtpu: 0.0.40
codegen_flags: <defaults>
</compile_context>

<pallas_src>
import jax
import jax.numpy as jnp
from jax import lax
from jax.experimental import pallas as pl
from jax.experimental.pallas import tpu as pltpu

BN_EPS = 1e-5
_VMEM_LIMIT = 32 * 1024 * 1024  # fits v5e/v6e/v7x scoped-VMEM budgets


# --------------------------------------------------------------------------
# in-kernel helpers
# --------------------------------------------------------------------------
def _conv1x1(w, x):
    """(Cout, Cin) @ (Cin, L) -> (Cout, L), f32.

    For tiny channel counts the MXU would run at <1% of a pass and pay
    operand-layout shuffles, so unroll the contraction as Cin broadcasted
    multiply-adds on the VPU (sublanes = channels, lanes = spatial).
    """
    cout, cin = w.shape
    if cin <= 16 and cout <= 32:
        acc = w[:, 0:1] * x[0:1, :]
        for k in range(1, cin):
            acc = acc + w[:, k:k + 1] * x[k:k + 1, :]
        return acc.astype(jnp.float32)
    return jnp.dot(w, x, preferred_element_type=jnp.float32)


def _stats1_kernel(x_ref, w1_ref, b1_ref, sum_ref, sq_ref):
    # Accumulate per-channel sum / sum-of-squares of h1 = conv1(x) over the
    # spatial tiles of one batch element (output block = resident accumulator).
    @pl.when(pl.program_id(1) == 0)
    def _():
        sum_ref[...] = jnp.zeros_like(sum_ref)
        sq_ref[...] = jnp.zeros_like(sq_ref)

    x = x_ref[0]                                      # (Cin, L)
    h = _conv1x1(w1_ref[...], x) + b1_ref[...]        # (Cout, L)
    sum_ref[0] += jnp.sum(h, axis=1, keepdims=True)
    sq_ref[0] += jnp.sum(h * h, axis=1, keepdims=True)


def _stats2_kernel(x_ref, w1_ref, b1_ref, w2_ref, b2_ref, sum_ref, sq_ref):
    # BN1 already folded into (w1, b1); accumulate stats of h2 = conv2(relu(.)).
    @pl.when(pl.program_id(1) == 0)
    def _():
        sum_ref[...] = jnp.zeros_like(sum_ref)
        sq_ref[...] = jnp.zeros_like(sq_ref)

    x = x_ref[0]
    a = jnp.maximum(_conv1x1(w1_ref[...], x) + b1_ref[...], 0.0)
    h2 = _conv1x1(w2_ref[...], a) + b2_ref[...]
    sum_ref[0] += jnp.sum(h2, axis=1, keepdims=True)
    sq_ref[0] += jnp.sum(h2 * h2, axis=1, keepdims=True)


def _final_kernel(x_ref, w1_ref, b1_ref, w2_ref, b2_ref, o_ref):
    # Both BN layers folded into the convs -> pure map, lane-dense store.
    x = x_ref[0]
    a = jnp.maximum(_conv1x1(w1_ref[...], x) + b1_ref[...], 0.0)
    o_ref[0] = (_conv1x1(w2_ref[...], a) + b2_ref[...]).astype(o_ref.dtype)


# --------------------------------------------------------------------------
# pallas_call wrappers
# --------------------------------------------------------------------------
def _pick_lane_tile(hw, cin, cout):
    """Largest 128-multiple spatial tile dividing hw that stays small in VMEM."""
    if hw % 128 != 0:
        return hw                       # full-extent block (legal: equals array dim)
    budget = 4 * 1024 * 1024            # bytes for the live tile working set
    per_lane = 4 * (2 * cin + 3 * cout)  # x (double-buffered) + a/h2/out tiles, f32
    for t in (8192, 4096, 2048, 1024, 512, 256, 128):
        if hw % t == 0 and per_lane * t <= budget:
            return t
    return 128


def _param_specs(weights):
    # Full-array blocks with constant index maps: stay resident, no per-step DMA.
    return [pl.BlockSpec(w.shape, (lambda i, j, _nd=w.ndim: (0,) * _nd))
            for w in weights]


def _stats_call(kernel, x3d, weights, cout, lane_tile):
    n, cin, hw = x3d.shape
    grid = (n, hw // lane_tile)

    x_spec = pl.BlockSpec((1, cin, lane_tile), lambda i, j: (i, 0, j))
    stat_spec = pl.BlockSpec((1, cout, 1), lambda i, j: (i, 0, 0))
    stat_shape = jax.ShapeDtypeStruct((n, cout, 1), jnp.float32)

    sums, sqs = pl.pallas_call(
        kernel,
        out_shape=(stat_shape, stat_shape),
        grid_spec=pltpu.PrefetchScalarGridSpec(
            num_scalar_prefetch=0,
            grid=grid,
            in_specs=[x_spec] + _param_specs(weights),
            out_specs=[stat_spec, stat_spec],
        ),
        compiler_params=pltpu.CompilerParams(
            dimension_semantics=("parallel", "arbitrary"),
            vmem_limit_bytes=_VMEM_LIMIT),
    )(x3d, *weights)
    # Reduce per-batch partials to per-channel totals (tiny plain-JAX glue).
    return jnp.sum(sums, axis=(0, 2)), jnp.sum(sqs, axis=(0, 2))


def _final_call(x3d, weights, cout, lane_tile):
    n, cin, hw = x3d.shape
    grid = (n, hw // lane_tile)

    x_spec = pl.BlockSpec((1, cin, lane_tile), lambda i, j: (i, 0, j))
    o_spec = pl.BlockSpec((1, cout, lane_tile), lambda i, j: (i, 0, j))

    return pl.pallas_call(
        _final_kernel,
        out_shape=jax.ShapeDtypeStruct((n, cout, hw), jnp.float32),
        grid_spec=pltpu.PrefetchScalarGridSpec(
            num_scalar_prefetch=0,
            grid=grid,
            in_specs=[x_spec] + _param_specs(weights),
            out_specs=o_spec,
        ),
        compiler_params=pltpu.CompilerParams(
            dimension_semantics=("parallel", "parallel"),
            vmem_limit_bytes=_VMEM_LIMIT),
    )(x3d, *weights)


def ffn_pallas(x_nchw, params):
    """x_nchw: (N, Cin, H, W) f32 -> (N, Cout, H, W) f32."""
    w1, b1, g1, be1, w2, b2, g2, be2 = params        # w1: (Cout, Cin), w2: (Cout, Cout)
    n, cin, h, w = x_nchw.shape
    cout = w1.shape[0]
    hw = h * w
    m = float(n * hw)

    # Keep NCHW: pure reshape, channels on sublanes, H*W on lanes.
    x3d = x_nchw.reshape(n, cin, hw)
    lane_tile = _pick_lane_tile(hw, cin, cout)

    b1c = b1.reshape(cout, 1)
    b2c = b2.reshape(cout, 1)

    # ---- pass 1: batch stats of h1 = conv1(x); fold BN1 into conv1 -----
    s1_sum, s1_sq = _stats_call(_stats1_kernel, x3d, (w1, b1c), cout, lane_tile)
    mu1 = s1_sum / m
    var1 = jnp.maximum(s1_sq / m - mu1 * mu1, 0.0)
    sc1 = g1 * lax.rsqrt(var1 + BN_EPS)
    w1f = w1 * sc1[:, None]
    b1f = ((b1 - mu1) * sc1 + be1).reshape(cout, 1)

    # ---- pass 2: batch stats of h2 = conv2(relu(bn1(.))); fold BN2 -----
    s2_sum, s2_sq = _stats_call(_stats2_kernel, x3d, (w1f, b1f, w2, b2c),
                                cout, lane_tile)
    mu2 = s2_sum / m
    var2 = jnp.maximum(s2_sq / m - mu2 * mu2, 0.0)
    sc2 = g2 * lax.rsqrt(var2 + BN_EPS)
    w2f = w2 * sc2[:, None]
    b2f = ((b2 - mu2) * sc2 + be2).reshape(cout, 1)

    # ---- pass 3: apply everything, lane-dense output --------------------
    out3d = _final_call(x3d, (w1f, b1f, w2f, b2f), cout, lane_tile)
    return out3d.reshape(n, cout, h, w)


# --------------------------------------------------------------------------
# pure-JAX reference + params + test
# --------------------------------------------------------------------------
def ffn_reference(x_nchw, params):
    w1, b1, g1, be1, w2, b2, g2, be2 = params
    n, cin, hh, ww = x_nchw.shape
    x = x_nchw.reshape(n, cin, hh * ww).astype(jnp.float32)

    def bn(v, g, b):
        mu = jnp.mean(v, axis=(0, 2), keepdims=True)
        var = jnp.mean((v - mu) ** 2, axis=(0, 2), keepdims=True)
        return (v - mu) / jnp.sqrt(var + BN_EPS) * g[None, :, None] + b[None, :, None]

    h = jnp.einsum('oc,ncl->nol', w1, x) + b1[None, :, None]
    h = jnp.maximum(bn(h, g1, be1), 0.0)
    h2 = jnp.einsum('oc,ncl->nol', w2, h) + b2[None, :, None]
    h2 = bn(h2, g2, be2)
    return h2.reshape(n, -1, hh, ww)


def init_params(key, in_channels, out_channels):
    """Deterministic synthetic params (Conv2d weight stored (out, in), like PyTorch)."""
    ks = jax.random.split(key, 6)
    w1 = 0.1 * jax.random.normal(ks[0], (out_channels, in_channels), jnp.float32)
    b1 = 0.1 * jax.random.normal(ks[1], (out_channels,), jnp.float32)
    w2 = 0.1 * jax.random.normal(ks[2], (out_channels, out_channels), jnp.float32)
    b2 = 0.1 * jax.random.normal(ks[3], (out_channels,), jnp.float32)
    g1 = 1.0 + 0.1 * jax.random.normal(ks[4], (out_channels,), jnp.float32)
    be1 = 0.1 * jax.random.normal(ks[5], (out_channels,), jnp.float32)
    g2 = 1.0 + 0.05 * jnp.arange(out_channels, dtype=jnp.float32)
    be2 = 0.01 * jnp.arange(out_channels, dtype=jnp.float32)
    return (w1, b1, g1, be1, w2, b2, g2, be2)


if __name__ == "__main__":
    key = jax.random.PRNGKey(0)
    k_x, k_p = jax.random.split(key)

    N, C_IN, C_OUT, H, W = 2, 4, 8, 16, 16
    x = jax.random.normal(k_x, (N, C_IN, H, W), jnp.float32)
    params = init_params(k_p, C_IN, C_OUT)

    out = jax.jit(ffn_pallas)(x, params)
    out = jax.block_until_ready(out)

    ref = ffn_reference(x, params)
    assert out.shape == (N, C_OUT, H, W)
    assert jnp.allclose(out, ref, atol=1e-4, rtol=1e-4), "mismatch vs reference"

    print("KERNEL_OK")
</pallas_src>

<mosaic_0001>
module attributes {stable_mosaic.version = 11 : i64} {
  func.func @_stats1_kernel(%arg0: i32, %arg1: i32, %arg2: memref<1x4x256xf32, #tpu.memory_space<vmem>>, %arg3: memref<8x4xf32, #tpu.memory_space<vmem>>, %arg4: memref<8x1xf32, #tpu.memory_space<vmem>>, %arg5: memref<1x8x1xf32, #tpu.memory_space<vmem>>, %arg6: memref<1x8x1xf32, #tpu.memory_space<vmem>>) attributes {dimension_semantics = [#tpu.dimension_semantics<parallel>, #tpu.dimension_semantics<arbitrary>], iteration_bounds = array<i64: 2, 1>, scalar_prefetch = 0 : i64, scratch_operands = 0 : i64, tpu.core_type = #tpu.core_type<tc>, window_params = [{transform_indices = @transform_0, window_bounds = array<i64: 1, 4, 256>}, {pipeline_mode = #tpu.pipeline_mode<synchronous>, transform_indices = @transform_1, window_bounds = array<i64: 8, 4>}, {pipeline_mode = #tpu.pipeline_mode<synchronous>, transform_indices = @transform_2, window_bounds = array<i64: 8, 1>}, {transform_indices = @transform_3, window_bounds = array<i64: 1, 8, 1>}, {transform_indices = @transform_4, window_bounds = array<i64: 1, 8, 1>}]} {
    %c0_i32 = arith.constant 0 : i32
    %0 = arith.cmpi eq, %arg1, %c0_i32 : i32
    %1 = arith.extui %0 : i1 to i32
    %c0_i32_0 = arith.constant 0 : i32
    %2 = arith.cmpi ne, %1, %c0_i32_0 : i32
    scf.if %2 {
      %cst_20 = arith.constant 0.000000e+00 : f32
      %49 = vector.broadcast %cst_20 : f32 to vector<1x8x1xf32>
      %c0_21 = arith.constant 0 : index
      %c0_22 = arith.constant 0 : index
      %c0_23 = arith.constant 0 : index
      %50 = vector.load %arg5[%c0_21, %c0_22, %c0_23] : memref<1x8x1xf32, #tpu.memory_space<vmem>>, vector<1x8x1xf32>
      tpu.vector_store %arg5[%c0_21, %c0_22, %c0_23], %49 {strides = array<i32>} : memref<1x8x1xf32, #tpu.memory_space<vmem>>, vector<1x8x1xf32>,
      %cst_24 = arith.constant 0.000000e+00 : f32
      %51 = vector.broadcast %cst_24 : f32 to vector<1x8x1xf32>
      %c0_25 = arith.constant 0 : index
      %c0_26 = arith.constant 0 : index
      %c0_27 = arith.constant 0 : index
      %52 = vector.load %arg6[%c0_25, %c0_26, %c0_27] : memref<1x8x1xf32, #tpu.memory_space<vmem>>, vector<1x8x1xf32>
      tpu.vector_store %arg6[%c0_25, %c0_26, %c0_27], %51 {strides = array<i32>} : memref<1x8x1xf32, #tpu.memory_space<vmem>>, vector<1x8x1xf32>,
    } else {
    }
    %c0 = arith.constant 0 : index
    %c0_1 = arith.constant 0 : index
    %c0_2 = arith.constant 0 : index
    %3 = vector.load %arg2[%c0, %c0_1, %c0_2] : memref<1x4x256xf32, #tpu.memory_space<vmem>>, vector<1x4x256xf32>
    %4 = vector.shape_cast %3 : vector<1x4x256xf32> to vector<4x256xf32>
    %c0_3 = arith.constant 0 : index
    %c0_4 = arith.constant 0 : index
    %5 = vector.load %arg3[%c0_3, %c0_4] : memref<8x4xf32, #tpu.memory_space<vmem>>, vector<8x4xf32>
    %6 = vector.extract_strided_slice %5 {offsets = [0, 0], sizes = [8, 1], strides = [1, 1]} : vector<8x4xf32> to vector<8x1xf32>
    %7 = vector.extract_strided_slice %4 {offsets = [0, 0], sizes = [1, 256], strides = [1, 1]} : vector<4x256xf32> to vector<1x256xf32>
    %8 = vector.broadcast %6 : vector<8x1xf32> to vector<8x256xf32>
    %9 = vector.broadcast %7 : vector<1x256xf32> to vector<8x256xf32>
    %10 = arith.mulf %8, %9 : vector<8x256xf32>
    %11 = vector.extract_strided_slice %5 {offsets = [0, 1], sizes = [8, 1], strides = [1, 1]} : vector<8x4xf32> to vector<8x1xf32>
    %12 = vector.extract_strided_slice %4 {offsets = [1, 0], sizes = [1, 256], strides = [1, 1]} : vector<4x256xf32> to vector<1x256xf32>
    %13 = vector.broadcast %11 : vector<8x1xf32> to vector<8x256xf32>
    %14 = vector.broadcast %12 : vector<1x256xf32> to vector<8x256xf32>
    %15 = arith.mulf %13, %14 : vector<8x256xf32>
    %16 = arith.addf %10, %15 : vector<8x256xf32>
    %17 = vector.extract_strided_slice %5 {offsets = [0, 2], sizes = [8, 1], strides = [1, 1]} : vector<8x4xf32> to vector<8x1xf32>
    %18 = vector.extract_strided_slice %4 {offsets = [2, 0], sizes = [1, 256], strides = [1, 1]} : vector<4x256xf32> to vector<1x256xf32>
    %19 = vector.broadcast %17 : vector<8x1xf32> to vector<8x256xf32>
    %20 = vector.broadcast %18 : vector<1x256xf32> to vector<8x256xf32>
    %21 = arith.mulf %19, %20 : vector<8x256xf32>
    %22 = arith.addf %16, %21 : vector<8x256xf32>
    %23 = vector.extract_strided_slice %5 {offsets = [0, 3], sizes = [8, 1], strides = [1, 1]} : vector<8x4xf32> to vector<8x1xf32>
    %24 = vector.extract_strided_slice %4 {offsets = [3, 0], sizes = [1, 256], strides = [1, 1]} : vector<4x256xf32> to vector<1x256xf32>
    %25 = vector.broadcast %23 : vector<8x1xf32> to vector<8x256xf32>
    %26 = vector.broadcast %24 : vector<1x256xf32> to vector<8x256xf32>
    %27 = arith.mulf %25, %26 : vector<8x256xf32>
    %28 = arith.addf %22, %27 : vector<8x256xf32>
    %c0_5 = arith.constant 0 : index
    %c0_6 = arith.constant 0 : index
    %29 = vector.load %arg4[%c0_5, %c0_6] : memref<8x1xf32, #tpu.memory_space<vmem>>, vector<8x1xf32>
    %30 = vector.broadcast %29 : vector<8x1xf32> to vector<8x256xf32>
    %31 = arith.addf %28, %30 : vector<8x256xf32>
    %c0_7 = arith.constant 0 : index
    %c0_8 = arith.constant 0 : index
    %c0_9 = arith.constant 0 : index
    %32 = vector.load %arg5[%c0_7, %c0_8, %c0_9] : memref<1x8x1xf32, #tpu.memory_space<vmem>>, vector<1x8x1xf32>
    %33 = vector.shape_cast %32 : vector<1x8x1xf32> to vector<8x1xf32>
    %cst = arith.constant dense<0.000000e+00> : vector<8xf32>
    %34 = vector.multi_reduction <add>, %31, %cst [1] : vector<8x256xf32> to vector<8xf32>
    %35 = vector.shape_cast %34 : vector<8xf32> to vector<8x1xf32>
    %36 = arith.addf %33, %35 : vector<8x1xf32>
    %c0_10 = arith.constant 0 : index
    %c0_11 = arith.constant 0 : index
    %c0_12 = arith.constant 0 : index
    %37 = vector.load %arg5[%c0_10, %c0_11, %c0_12] : memref<1x8x1xf32, #tpu.memory_space<vmem>>, vector<1x8x1xf32>
    %38 = vector.shape_cast %37 : vector<1x8x1xf32> to vector<8x1xf32>
    %39 = vector.shape_cast %36 : vector<8x1xf32> to vector<1x8x1xf32>
    tpu.vector_store %arg5[%c0_10, %c0_11, %c0_12], %39 {strides = array<i32>} : memref<1x8x1xf32, #tpu.memory_space<vmem>>, vector<1x8x1xf32>,
    %c0_13 = arith.constant 0 : index
    %c0_14 = arith.constant 0 : index
    %c0_15 = arith.constant 0 : index
    %40 = vector.load %arg6[%c0_13, %c0_14, %c0_15] : memref<1x8x1xf32, #tpu.memory_space<vmem>>, vector<1x8x1xf32>
    %41 = vector.shape_cast %40 : vector<1x8x1xf32> to vector<8x1xf32>
    %42 = arith.mulf %31, %31 : vector<8x256xf32>
    %cst_16 = arith.constant dense<0.000000e+00> : vector<8xf32>
    %43 = vector.multi_reduction <add>, %42, %cst_16 [1] : vector<8x256xf32> to vector<8xf32>
    %44 = vector.shape_cast %43 : vector<8xf32> to vector<8x1xf32>
    %45 = arith.addf %41, %44 : vector<8x1xf32>
    %c0_17 = arith.constant 0 : index
    %c0_18 = arith.constant 0 : index
    %c0_19 = arith.constant 0 : index
    %46 = vector.load %arg6[%c0_17, %c0_18, %c0_19] : memref<1x8x1xf32, #tpu.memory_space<vmem>>, vector<1x8x1xf32>
    %47 = vector.shape_cast %46 : vector<1x8x1xf32> to vector<8x1xf32>
    %48 = vector.shape_cast %45 : vector<8x1xf32> to vector<1x8x1xf32>
    tpu.vector_store %arg6[%c0_17, %c0_18, %c0_19], %48 {strides = array<i32>} : memref<1x8x1xf32, #tpu.memory_space<vmem>>, vector<1x8x1xf32>,
    return
  }
  func.func @transform_0(%arg0: i32, %arg1: i32) -> (i32, i32, i32) {
    %c0_i32 = arith.constant 0 : i32
    %c0_i32_0 = arith.constant 0 : i32
    return %arg0, %c0_i32, %arg1 : i32, i32, i32
  }
  func.func @transform_1(%arg0: i32, %arg1: i32) -> (i32, i32) {
    %c0_i32 = arith.constant 0 : i32
    %c0_i32_0 = arith.constant 0 : i32
    %c0_i32_1 = arith.constant 0 : i32
    return %c0_i32, %c0_i32_0 : i32, i32
  }
  func.func @transform_2(%arg0: i32, %arg1: i32) -> (i32, i32) {
    %c0_i32 = arith.constant 0 : i32
    %c0_i32_0 = arith.constant 0 : i32
    %c0_i32_1 = arith.constant 0 : i32
    return %c0_i32, %c0_i32_0 : i32, i32
  }
  func.func @transform_3(%arg0: i32, %arg1: i32) -> (i32, i32, i32) {
    %c0_i32 = arith.constant 0 : i32
    %c0_i32_0 = arith.constant 0 : i32
    %c0_i32_1 = arith.constant 0 : i32
    return %arg0, %c0_i32, %c0_i32_0 : i32, i32, i32
  }
  func.func @transform_4(%arg0: i32, %arg1: i32) -> (i32, i32, i32) {
    %c0_i32 = arith.constant 0 : i32
    %c0_i32_0 = arith.constant 0 : i32
    %c0_i32_1 = arith.constant 0 : i32
    return %arg0, %c0_i32, %c0_i32_0 : i32, i32, i32
  }
}

module attributes {stable_mosaic.version = 11 : i64} {
  func.func @_stats2_kernel(%arg0: i32, %arg1: i32, %arg2: memref<1x4x256xf32, #tpu.memory_space<vmem>>, %arg3: memref<8x4xf32, #tpu.memory_space<vmem>>, %arg4: memref<8x1xf32, #tpu.memory_space<vmem>>, %arg5: memref<8x8xf32, #tpu.memory_space<vmem>>, %arg6: memref<8x1xf32, #tpu.memory_space<vmem>>, %arg7: memref<1x8x1xf32, #tpu.memory_space<vmem>>, %arg8: memref<1x8x1xf32, #tpu.memory_space<vmem>>) attributes {dimension_semantics = [#tpu.dimension_semantics<parallel>, #tpu.dimension_semantics<arbitrary>], iteration_bounds = array<i64: 2, 1>, scalar_prefetch = 0 : i64, scratch_operands = 0 : i64, tpu.core_type = #tpu.core_type<tc>, window_params = [{transform_indices = @transform_0, window_bounds = array<i64: 1, 4, 256>}, {pipeline_mode = #tpu.pipeline_mode<synchronous>, transform_indices = @transform_1, window_bounds = array<i64: 8, 4>}, {pipeline_mode = #tpu.pipeline_mode<synchronous>, transform_indices = @transform_2, window_bounds = array<i64: 8, 1>}, {pipeline_mode = #tpu.pipeline_mode<synchronous>, transform_indices = @transform_3, window_bounds = array<i64: 8, 8>}, {pipeline_mode = #tpu.pipeline_mode<synchronous>, transform_indices = @transform_4, window_bounds = array<i64: 8, 1>}, {transform_indices = @transform_5, window_bounds = array<i64: 1, 8, 1>}, {transform_indices = @transform_6, window_bounds = array<i64: 1, 8, 1>}]} {
    %c0_i32 = arith.constant 0 : i32
    %0 = arith.cmpi eq, %arg1, %c0_i32 : i32
    %1 = arith.extui %0 : i1 to i32
    %c0_i32_0 = arith.constant 0 : i32
    %2 = arith.cmpi ne, %1, %c0_i32_0 : i32
    scf.if %2 {
      %cst_25 = arith.constant 0.000000e+00 : f32
      %102 = vector.broadcast %cst_25 : f32 to vector<1x8x1xf32>
      %c0_26 = arith.constant 0 : index
      %c0_27 = arith.constant 0 : index
      %c0_28 = arith.constant 0 : index
      %103 = vector.load %arg7[%c0_26, %c0_27, %c0_28] : memref<1x8x1xf32, #tpu.memory_space<vmem>>, vector<1x8x1xf32>
      tpu.vector_store %arg7[%c0_26, %c0_27, %c0_28], %102 {strides = array<i32>} : memref<1x8x1xf32, #tpu.memory_space<vmem>>, vector<1x8x1xf32>,
      %cst_29 = arith.constant 0.000000e+00 : f32
      %104 = vector.broadcast %cst_29 : f32 to vector<1x8x1xf32>
      %c0_30 = arith.constant 0 : index
      %c0_31 = arith.constant 0 : index
      %c0_32 = arith.constant 0 : index
      %105 = vector.load %arg8[%c0_30, %c0_31, %c0_32] : memref<1x8x1xf32, #tpu.memory_space<vmem>>, vector<1x8x1xf32>
      tpu.vector_store %arg8[%c0_30, %c0_31, %c0_32], %104 {strides = array<i32>} : memref<1x8x1xf32, #tpu.memory_space<vmem>>, vector<1x8x1xf32>,
    } else {
    }
    %c0 = arith.constant 0 : index
    %c0_1 = arith.constant 0 : index
    %c0_2 = arith.constant 0 : index
    %3 = vector.load %arg2[%c0, %c0_1, %c0_2] : memref<1x4x256xf32, #tpu.memory_space<vmem>>, vector<1x4x256xf32>
    %4 = vector.shape_cast %3 : vector<1x4x256xf32> to vector<4x256xf32>
    %c0_3 = arith.constant 0 : index
    %c0_4 = arith.constant 0 : index
    %5 = vector.load %arg3[%c0_3, %c0_4] : memref<8x4xf32, #tpu.memory_space<vmem>>, vector<8x4xf32>
    %6 = vector.extract_strided_slice %5 {offsets = [0, 0], sizes = [8, 1], strides = [1, 1]} : vector<8x4xf32> to vector<8x1xf32>
    %7 = vector.extract_strided_slice %4 {offsets = [0, 0], sizes = [1, 256], strides = [1, 1]} : vector<4x256xf32> to vector<1x256xf32>
    %8 = vector.broadcast %6 : vector<8x1xf32> to vector<8x256xf32>
    %9 = vector.broadcast %7 : vector<1x256xf32> to vector<8x256xf32>
    %10 = arith.mulf %8, %9 : vector<8x256xf32>
    %11 = vector.extract_strided_slice %5 {offsets = [0, 1], sizes = [8, 1], strides = [1, 1]} : vector<8x4xf32> to vector<8x1xf32>
    %12 = vector.extract_strided_slice %4 {offsets = [1, 0], sizes = [1, 256], strides = [1, 1]} : vector<4x256xf32> to vector<1x256xf32>
    %13 = vector.broadcast %11 : vector<8x1xf32> to vector<8x256xf32>
    %14 = vector.broadcast %12 : vector<1x256xf32> to vector<8x256xf32>
    %15 = arith.mulf %13, %14 : vector<8x256xf32>
    %16 = arith.addf %10, %15 : vector<8x256xf32>
    %17 = vector.extract_strided_slice %5 {offsets = [0, 2], sizes = [8, 1], strides = [1, 1]} : vector<8x4xf32> to vector<8x1xf32>
    %18 = vector.extract_strided_slice %4 {offsets = [2, 0], sizes = [1, 256], strides = [1, 1]} : vector<4x256xf32> to vector<1x256xf32>
    %19 = vector.broadcast %17 : vector<8x1xf32> to vector<8x256xf32>
    %20 = vector.broadcast %18 : vector<1x256xf32> to vector<8x256xf32>
    %21 = arith.mulf %19, %20 : vector<8x256xf32>
    %22 = arith.addf %16, %21 : vector<8x256xf32>
    %23 = vector.extract_strided_slice %5 {offsets = [0, 3], sizes = [8, 1], strides = [1, 1]} : vector<8x4xf32> to vector<8x1xf32>
    %24 = vector.extract_strided_slice %4 {offsets = [3, 0], sizes = [1, 256], strides = [1, 1]} : vector<4x256xf32> to vector<1x256xf32>
    %25 = vector.broadcast %23 : vector<8x1xf32> to vector<8x256xf32>
    %26 = vector.broadcast %24 : vector<1x256xf32> to vector<8x256xf32>
    %27 = arith.mulf %25, %26 : vector<8x256xf32>
    %28 = arith.addf %22, %27 : vector<8x256xf32>
    %c0_5 = arith.constant 0 : index
    %c0_6 = arith.constant 0 : index
    %29 = vector.load %arg4[%c0_5, %c0_6] : memref<8x1xf32, #tpu.memory_space<vmem>>, vector<8x1xf32>
    %30 = vector.broadcast %29 : vector<8x1xf32> to vector<8x256xf32>
    %31 = arith.addf %28, %30 : vector<8x256xf32>
    %cst = arith.constant 0.000000e+00 : f32
    %32 = vector.broadcast %cst : f32 to vector<8x256xf32>
    %33 = arith.maximumf %31, %32 : vector<8x256xf32>
    %c0_7 = arith.constant 0 : index
    %c0_8 = arith.constant 0 : index
    %34 = vector.load %arg5[%c0_7, %c0_8] : memref<8x8xf32, #tpu.memory_space<vmem>>, vector<8x8xf32>
    %35 = vector.extract_strided_slice %34 {offsets = [0, 0], sizes = [8, 1], strides = [1, 1]} : vector<8x8xf32> to vector<8x1xf32>
    %36 = vector.extract_strided_slice %33 {offsets = [0, 0], sizes = [1, 256], strides = [1, 1]} : vector<8x256xf32> to vector<1x256xf32>
    %37 = vector.broadcast %35 : vector<8x1xf32> to vector<8x256xf32>
    %38 = vector.broadcast %36 : vector<1x256xf32> to vector<8x256xf32>
    %39 = arith.mulf %37, %38 : vector<8x256xf32>
    %40 = vector.extract_strided_slice %34 {offsets = [0, 1], sizes = [8, 1], strides = [1, 1]} : vector<8x8xf32> to vector<8x1xf32>
    %41 = vector.extract_strided_slice %33 {offsets = [1, 0], sizes = [1, 256], strides = [1, 1]} : vector<8x256xf32> to vector<1x256xf32>
    %42 = vector.broadcast %40 : vector<8x1xf32> to vector<8x256xf32>
    %43 = vector.broadcast %41 : vector<1x256xf32> to vector<8x256xf32>
    %44 = arith.mulf %42, %43 : vector<8x256xf32>
    %45 = arith.addf %39, %44 : vector<8x256xf32>
    %46 = vector.extract_strided_slice %34 {offsets = [0, 2], sizes = [8, 1], strides = [1, 1]} : vector<8x8xf32> to vector<8x1xf32>
    %47 = vector.extract_strided_slice %33 {offsets = [2, 0], sizes = [1, 256], strides = [1, 1]} : vector<8x256xf32> to vector<1x256xf32>
    %48 = vector.broadcast %46 : vector<8x1xf32> to vector<8x256xf32>
    %49 = vector.broadcast %47 : vector<1x256xf32> to vector<8x256xf32>
    %50 = arith.mulf %48, %49 : vector<8x256xf32>
    %51 = arith.addf %45, %50 : vector<8x256xf32>
    %52 = vector.extract_strided_slice %34 {offsets = [0, 3], sizes = [8, 1], strides = [1, 1]} : vector<8x8xf32> to vector<8x1xf32>
    %53 = vector.extract_strided_slice %33 {offsets = [3, 0], sizes = [1, 256], strides = [1, 1]} : vector<8x256xf32> to vector<1x256xf32>
    %54 = vector.broadcast %52 : vector<8x1xf32> to vector<8x256xf32>
    %55 = vector.broadcast %53 : vector<1x256xf32> to vector<8x256xf32>
    %56 = arith.mulf %54, %55 : vector<8x256xf32>
    %57 = arith.addf %51, %56 : vector<8x256xf32>
    %58 = vector.extract_strided_slice %34 {offsets = [0, 4], sizes = [8, 1], strides = [1, 1]} : vector<8x8xf32> to vector<8x1xf32>
    %59 = vector.extract_strided_slice %33 {offsets = [4, 0], sizes = [1, 256], strides = [1, 1]} : vector<8x256xf32> to vector<1x256xf32>
    %60 = vector.broadcast %58 : vector<8x1xf32> to vector<8x256xf32>
    %61 = vector.broadcast %59 : vector<1x256xf32> to vector<8x256xf32>
    %62 = arith.mulf %60, %61 : vector<8x256xf32>
    %63 = arith.addf %57, %62 : vector<8x256xf32>
    %64 = vector.extract_strided_slice %34 {offsets = [0, 5], sizes = [8, 1], strides = [1, 1]} : vector<8x8xf32> to vector<8x1xf32>
    %65 = vector.extract_strided_slice %33 {offsets = [5, 0], sizes = [1, 256], strides = [1, 1]} : vector<8x256xf32> to vector<1x256xf32>
    %66 = vector.broadcast %64 : vector<8x1xf32> to vector<8x256xf32>
    %67 = vector.broadcast %65 : vector<1x256xf32> to vector<8x256xf32>
    %68 = arith.mulf %66, %67 : vector<8x256xf32>
    %69 = arith.addf %63, %68 : vector<8x256xf32>
    %70 = vector.extract_strided_slice %34 {offsets = [0, 6], sizes = [8, 1], strides = [1, 1]} : vector<8x8xf32> to vector<8x1xf32>
    %71 = vector.extract_strided_slice %33 {offsets = [6, 0], sizes = [1, 256], strides = [1, 1]} : vector<8x256xf32> to vector<1x256xf32>
    %72 = vector.broadcast %70 : vector<8x1xf32> to vector<8x256xf32>
    %73 = vector.broadcast %71 : vector<1x256xf32> to vector<8x256xf32>
    %74 = arith.mulf %72, %73 : vector<8x256xf32>
    %75 = arith.addf %69, %74 : vector<8x256xf32>
    %76 = vector.extract_strided_slice %34 {offsets = [0, 7], sizes = [8, 1], strides = [1, 1]} : vector<8x8xf32> to vector<8x1xf32>
    %77 = vector.extract_strided_slice %33 {offsets = [7, 0], sizes = [1, 256], strides = [1, 1]} : vector<8x256xf32> to vector<1x256xf32>
    %78 = vector.broadcast %76 : vector<8x1xf32> to vector<8x256xf32>
    %79 = vector.broadcast %77 : vector<1x256xf32> to vector<8x256xf32>
    %80 = arith.mulf %78, %79 : vector<8x256xf32>
    %81 = arith.addf %75, %80 : vector<8x256xf32>
    %c0_9 = arith.constant 0 : index
    %c0_10 = arith.constant 0 : index
    %82 = vector.load %arg6[%c0_9, %c0_10] : memref<8x1xf32, #tpu.memory_space<vmem>>, vector<8x1xf32>
    %83 = vector.broadcast %82 : vector<8x1xf32> to vector<8x256xf32>
    %84 = arith.addf %81, %83 : vector<8x256xf32>
    %c0_11 = arith.constant 0 : index
    %c0_12 = arith.constant 0 : index
    %c0_13 = arith.constant 0 : index
    %85 = vector.load %arg7[%c0_11, %c0_12, %c0_13] : memref<1x8x1xf32, #tpu.memory_space<vmem>>, vector<1x8x1xf32>
    %86 = vector.shape_cast %85 : vector<1x8x1xf32> to vector<8x1xf32>
    %cst_14 = arith.constant dense<0.000000e+00> : vector<8xf32>
    %87 = vector.multi_reduction <add>, %84, %cst_14 [1] : vector<8x256xf32> to vector<8xf32>
    %88 = vector.shape_cast %87 : vector<8xf32> to vector<8x1xf32>
    %89 = arith.addf %86, %88 : vector<8x1xf32>
    %c0_15 = arith.constant 0 : index
    %c0_16 = arith.constant 0 : index
    %c0_17 = arith.constant 0 : index
    %90 = vector.load %arg7[%c0_15, %c0_16, %c0_17] : memref<1x8x1xf32, #tpu.memory_space<vmem>>, vector<1x8x1xf32>
    %91 = vector.shape_cast %90 : vector<1x8x1xf32> to vector<8x1xf32>
    %92 = vector.shape_cast %89 : vector<8x1xf32> to vector<1x8x1xf32>
    tpu.vector_store %arg7[%c0_15, %c0_16, %c0_17], %92 {strides = array<i32>} : memref<1x8x1xf32, #tpu.memory_space<vmem>>, vector<1x8x1xf32>,
    %c0_18 = arith.constant 0 : index
    %c0_19 = arith.constant 0 : index
    %c0_20 = arith.constant 0 : index
    %93 = vector.load %arg8[%c0_18, %c0_19, %c0_20] : memref<1x8x1xf32, #tpu.memory_space<vmem>>, vector<1x8x1xf32>
    %94 = vector.shape_cast %93 : vector<1x8x1xf32> to vector<8x1xf32>
    %95 = arith.mulf %84, %84 : vector<8x256xf32>
    %cst_21 = arith.constant dense<0.000000e+00> : vector<8xf32>
    %96 = vector.multi_reduction <add>, %95, %cst_21 [1] : vector<8x256xf32> to vector<8xf32>
    %97 = vector.shape_cast %96 : vector<8xf32> to vector<8x1xf32>
    %98 = arith.addf %94, %97 : vector<8x1xf32>
    %c0_22 = arith.constant 0 : index
    %c0_23 = arith.constant 0 : index
    %c0_24 = arith.constant 0 : index
    %99 = vector.load %arg8[%c0_22, %c0_23, %c0_24] : memref<1x8x1xf32, #tpu.memory_space<vmem>>, vector<1x8x1xf32>
    %100 = vector.shape_cast %99 : vector<1x8x1xf32> to vector<8x1xf32>
    %101 = vector.shape_cast %98 : vector<8x1xf32> to vector<1x8x1xf32>
    tpu.vector_store %arg8[%c0_22, %c0_23, %c0_24], %101 {strides = array<i32>} : memref<1x8x1xf32, #tpu.memory_space<vmem>>, vector<1x8x1xf32>,
    return
  }
  func.func @transform_0(%arg0: i32, %arg1: i32) -> (i32, i32, i32) {
    %c0_i32 = arith.constant 0 : i32
    %c0_i32_0 = arith.constant 0 : i32
    return %arg0, %c0_i32, %arg1 : i32, i32, i32
  }
  func.func @transform_1(%arg0: i32, %arg1: i32) -> (i32, i32) {
    %c0_i32 = arith.constant 0 : i32
    %c0_i32_0 = arith.constant 0 : i32
    %c0_i32_1 = arith.constant 0 : i32
    return %c0_i32, %c0_i32_0 : i32, i32
  }
  func.func @transform_2(%arg0: i32, %arg1: i32) -> (i32, i32) {
    %c0_i32 = arith.constant 0 : i32
    %c0_i32_0 = arith.constant 0 : i32
    %c0_i32_1 = arith.constant 0 : i32
    return %c0_i32, %c0_i32_0 : i32, i32
  }
  func.func @transform_3(%arg0: i32, %arg1: i32) -> (i32, i32) {
    %c0_i32 = arith.constant 0 : i32
    %c0_i32_0 = arith.constant 0 : i32
    %c0_i32_1 = arith.constant 0 : i32
    return %c0_i32, %c0_i32_0 : i32, i32
  }
  func.func @transform_4(%arg0: i32, %arg1: i32) -> (i32, i32) {
    %c0_i32 = arith.constant 0 : i32
    %c0_i32_0 = arith.constant 0 : i32
    %c0_i32_1 = arith.constant 0 : i32
    return %c0_i32, %c0_i32_0 : i32, i32
  }
  func.func @transform_5(%arg0: i32, %arg1: i32) -> (i32, i32, i32) {
    %c0_i32 = arith.constant 0 : i32
    %c0_i32_0 = arith.constant 0 : i32
    %c0_i32_1 = arith.constant 0 : i32
    return %arg0, %c0_i32, %c0_i32_0 : i32, i32, i32
  }
  func.func @transform_6(%arg0: i32, %arg1: i32) -> (i32, i32, i32) {
    %c0_i32 = arith.constant 0 : i32
    %c0_i32_0 = arith.constant 0 : i32
    %c0_i32_1 = arith.constant 0 : i32
    return %arg0, %c0_i32, %c0_i32_0 : i32, i32, i32
  }
}

module attributes {stable_mosaic.version = 11 : i64} {
  func.func @_final_kernel(%arg0: i32, %arg1: i32, %arg2: memref<1x4x256xf32, #tpu.memory_space<vmem>>, %arg3: memref<8x4xf32, #tpu.memory_space<vmem>>, %arg4: memref<8x1xf32, #tpu.memory_space<vmem>>, %arg5: memref<8x8xf32, #tpu.memory_space<vmem>>, %arg6: memref<8x1xf32, #tpu.memory_space<vmem>>, %arg7: memref<1x8x256xf32, #tpu.memory_space<vmem>>) attributes {dimension_semantics = [#tpu.dimension_semantics<parallel>, #tpu.dimension_semantics<parallel>], iteration_bounds = array<i64: 2, 1>, scalar_prefetch = 0 : i64, scratch_operands = 0 : i64, tpu.core_type = #tpu.core_type<tc>, window_params = [{transform_indices = @transform_0, window_bounds = array<i64: 1, 4, 256>}, {pipeline_mode = #tpu.pipeline_mode<synchronous>, transform_indices = @transform_1, window_bounds = array<i64: 8, 4>}, {pipeline_mode = #tpu.pipeline_mode<synchronous>, transform_indices = @transform_2, window_bounds = array<i64: 8, 1>}, {pipeline_mode = #tpu.pipeline_mode<synchronous>, transform_indices = @transform_3, window_bounds = array<i64: 8, 8>}, {pipeline_mode = #tpu.pipeline_mode<synchronous>, transform_indices = @transform_4, window_bounds = array<i64: 8, 1>}, {transform_indices = @transform_5, window_bounds = array<i64: 1, 8, 256>}]} {
    %c0 = arith.constant 0 : index
    %c0_0 = arith.constant 0 : index
    %c0_1 = arith.constant 0 : index
    %0 = vector.load %arg2[%c0, %c0_0, %c0_1] : memref<1x4x256xf32, #tpu.memory_space<vmem>>, vector<1x4x256xf32>
    %1 = vector.shape_cast %0 : vector<1x4x256xf32> to vector<4x256xf32>
    %c0_2 = arith.constant 0 : index
    %c0_3 = arith.constant 0 : index
    %2 = vector.load %arg3[%c0_2, %c0_3] : memref<8x4xf32, #tpu.memory_space<vmem>>, vector<8x4xf32>
    %3 = vector.extract_strided_slice %2 {offsets = [0, 0], sizes = [8, 1], strides = [1, 1]} : vector<8x4xf32> to vector<8x1xf32>
    %4 = vector.extract_strided_slice %1 {offsets = [0, 0], sizes = [1, 256], strides = [1, 1]} : vector<4x256xf32> to vector<1x256xf32>
    %5 = vector.broadcast %3 : vector<8x1xf32> to vector<8x256xf32>
    %6 = vector.broadcast %4 : vector<1x256xf32> to vector<8x256xf32>
    %7 = arith.mulf %5, %6 : vector<8x256xf32>
    %8 = vector.extract_strided_slice %2 {offsets = [0, 1], sizes = [8, 1], strides = [1, 1]} : vector<8x4xf32> to vector<8x1xf32>
    %9 = vector.extract_strided_slice %1 {offsets = [1, 0], sizes = [1, 256], strides = [1, 1]} : vector<4x256xf32> to vector<1x256xf32>
    %10 = vector.broadcast %8 : vector<8x1xf32> to vector<8x256xf32>
    %11 = vector.broadcast %9 : vector<1x256xf32> to vector<8x256xf32>
    %12 = arith.mulf %10, %11 : vector<8x256xf32>
    %13 = arith.addf %7, %12 : vector<8x256xf32>
    %14 = vector.extract_strided_slice %2 {offsets = [0, 2], sizes = [8, 1], strides = [1, 1]} : vector<8x4xf32> to vector<8x1xf32>
    %15 = vector.extract_strided_slice %1 {offsets = [2, 0], sizes = [1, 256], strides = [1, 1]} : vector<4x256xf32> to vector<1x256xf32>
    %16 = vector.broadcast %14 : vector<8x1xf32> to vector<8x256xf32>
    %17 = vector.broadcast %15 : vector<1x256xf32> to vector<8x256xf32>
    %18 = arith.mulf %16, %17 : vector<8x256xf32>
    %19 = arith.addf %13, %18 : vector<8x256xf32>
    %20 = vector.extract_strided_slice %2 {offsets = [0, 3], sizes = [8, 1], strides = [1, 1]} : vector<8x4xf32> to vector<8x1xf32>
    %21 = vector.extract_strided_slice %1 {offsets = [3, 0], sizes = [1, 256], strides = [1, 1]} : vector<4x256xf32> to vector<1x256xf32>
    %22 = vector.broadcast %20 : vector<8x1xf32> to vector<8x256xf32>
    %23 = vector.broadcast %21 : vector<1x256xf32> to vector<8x256xf32>
    %24 = arith.mulf %22, %23 : vector<8x256xf32>
    %25 = arith.addf %19, %24 : vector<8x256xf32>
    %c0_4 = arith.constant 0 : index
    %c0_5 = arith.constant 0 : index
    %26 = vector.load %arg4[%c0_4, %c0_5] : memref<8x1xf32, #tpu.memory_space<vmem>>, vector<8x1xf32>
    %27 = vector.broadcast %26 : vector<8x1xf32> to vector<8x256xf32>
    %28 = arith.addf %25, %27 : vector<8x256xf32>
    %cst = arith.constant 0.000000e+00 : f32
    %29 = vector.broadcast %cst : f32 to vector<8x256xf32>
    %30 = arith.maximumf %28, %29 : vector<8x256xf32>
    %c0_6 = arith.constant 0 : index
    %c0_7 = arith.constant 0 : index
    %31 = vector.load %arg5[%c0_6, %c0_7] : memref<8x8xf32, #tpu.memory_space<vmem>>, vector<8x8xf32>
    %32 = vector.extract_strided_slice %31 {offsets = [0, 0], sizes = [8, 1], strides = [1, 1]} : vector<8x8xf32> to vector<8x1xf32>
    %33 = vector.extract_strided_slice %30 {offsets = [0, 0], sizes = [1, 256], strides = [1, 1]} : vector<8x256xf32> to vector<1x256xf32>
    %34 = vector.broadcast %32 : vector<8x1xf32> to vector<8x256xf32>
    %35 = vector.broadcast %33 : vector<1x256xf32> to vector<8x256xf32>
    %36 = arith.mulf %34, %35 : vector<8x256xf32>
    %37 = vector.extract_strided_slice %31 {offsets = [0, 1], sizes = [8, 1], strides = [1, 1]} : vector<8x8xf32> to vector<8x1xf32>
    %38 = vector.extract_strided_slice %30 {offsets = [1, 0], sizes = [1, 256], strides = [1, 1]} : vector<8x256xf32> to vector<1x256xf32>
    %39 = vector.broadcast %37 : vector<8x1xf32> to vector<8x256xf32>
    %40 = vector.broadcast %38 : vector<1x256xf32> to vector<8x256xf32>
    %41 = arith.mulf %39, %40 : vector<8x256xf32>
    %42 = arith.addf %36, %41 : vector<8x256xf32>
    %43 = vector.extract_strided_slice %31 {offsets = [0, 2], sizes = [8, 1], strides = [1, 1]} : vector<8x8xf32> to vector<8x1xf32>
    %44 = vector.extract_strided_slice %30 {offsets = [2, 0], sizes = [1, 256], strides = [1, 1]} : vector<8x256xf32> to vector<1x256xf32>
    %45 = vector.broadcast %43 : vector<8x1xf32> to vector<8x256xf32>
    %46 = vector.broadcast %44 : vector<1x256xf32> to vector<8x256xf32>
    %47 = arith.mulf %45, %46 : vector<8x256xf32>
    %48 = arith.addf %42, %47 : vector<8x256xf32>
    %49 = vector.extract_strided_slice %31 {offsets = [0, 3], sizes = [8, 1], strides = [1, 1]} : vector<8x8xf32> to vector<8x1xf32>
    %50 = vector.extract_strided_slice %30 {offsets = [3, 0], sizes = [1, 256], strides = [1, 1]} : vector<8x256xf32> to vector<1x256xf32>
    %51 = vector.broadcast %49 : vector<8x1xf32> to vector<8x256xf32>
    %52 = vector.broadcast %50 : vector<1x256xf32> to vector<8x256xf32>
    %53 = arith.mulf %51, %52 : vector<8x256xf32>
    %54 = arith.addf %48, %53 : vector<8x256xf32>
    %55 = vector.extract_strided_slice %31 {offsets = [0, 4], sizes = [8, 1], strides = [1, 1]} : vector<8x8xf32> to vector<8x1xf32>
    %56 = vector.extract_strided_slice %30 {offsets = [4, 0], sizes = [1, 256], strides = [1, 1]} : vector<8x256xf32> to vector<1x256xf32>
    %57 = vector.broadcast %55 : vector<8x1xf32> to vector<8x256xf32>
    %58 = vector.broadcast %56 : vector<1x256xf32> to vector<8x256xf32>
    %59 = arith.mulf %57, %58 : vector<8x256xf32>
    %60 = arith.addf %54, %59 : vector<8x256xf32>
    %61 = vector.extract_strided_slice %31 {offsets = [0, 5], sizes = [8, 1], strides = [1, 1]} : vector<8x8xf32> to vector<8x1xf32>
    %62 = vector.extract_strided_slice %30 {offsets = [5, 0], sizes = [1, 256], strides = [1, 1]} : vector<8x256xf32> to vector<1x256xf32>
    %63 = vector.broadcast %61 : vector<8x1xf32> to vector<8x256xf32>
    %64 = vector.broadcast %62 : vector<1x256xf32> to vector<8x256xf32>
    %65 = arith.mulf %63, %64 : vector<8x256xf32>
    %66 = arith.addf %60, %65 : vector<8x256xf32>
    %67 = vector.extract_strided_slice %31 {offsets = [0, 6], sizes = [8, 1], strides = [1, 1]} : vector<8x8xf32> to vector<8x1xf32>
    %68 = vector.extract_strided_slice %30 {offsets = [6, 0], sizes = [1, 256], strides = [1, 1]} : vector<8x256xf32> to vector<1x256xf32>
    %69 = vector.broadcast %67 : vector<8x1xf32> to vector<8x256xf32>
    %70 = vector.broadcast %68 : vector<1x256xf32> to vector<8x256xf32>
    %71 = arith.mulf %69, %70 : vector<8x256xf32>
    %72 = arith.addf %66, %71 : vector<8x256xf32>
    %73 = vector.extract_strided_slice %31 {offsets = [0, 7], sizes = [8, 1], strides = [1, 1]} : vector<8x8xf32> to vector<8x1xf32>
    %74 = vector.extract_strided_slice %30 {offsets = [7, 0], sizes = [1, 256], strides = [1, 1]} : vector<8x256xf32> to vector<1x256xf32>
    %75 = vector.broadcast %73 : vector<8x1xf32> to vector<8x256xf32>
    %76 = vector.broadcast %74 : vector<1x256xf32> to vector<8x256xf32>
    %77 = arith.mulf %75, %76 : vector<8x256xf32>
    %78 = arith.addf %72, %77 : vector<8x256xf32>
    %c0_8 = arith.constant 0 : index
    %c0_9 = arith.constant 0 : index
    %79 = vector.load %arg6[%c0_8, %c0_9] : memref<8x1xf32, #tpu.memory_space<vmem>>, vector<8x1xf32>
    %80 = vector.broadcast %79 : vector<8x1xf32> to vector<8x256xf32>
    %81 = arith.addf %78, %80 : vector<8x256xf32>
    %c0_10 = arith.constant 0 : index
    %c0_11 = arith.constant 0 : index
    %c0_12 = arith.constant 0 : index
    %82 = vector.load %arg7[%c0_10, %c0_11, %c0_12] : memref<1x8x256xf32, #tpu.memory_space<vmem>>, vector<1x8x256xf32>
    %83 = vector.shape_cast %82 : vector<1x8x256xf32> to vector<8x256xf32>
    %84 = vector.shape_cast %81 : vector<8x256xf32> to vector<1x8x256xf32>
    tpu.vector_store %arg7[%c0_10, %c0_11, %c0_12], %84 {strides = array<i32>} : memref<1x8x256xf32, #tpu.memory_space<vmem>>, vector<1x8x256xf32>,
    return
  }
  func.func @transform_0(%arg0: i32, %arg1: i32) -> (i32, i32, i32) {
    %c0_i32 = arith.constant 0 : i32
    %c0_i32_0 = arith.constant 0 : i32
    return %arg0, %c0_i32, %arg1 : i32, i32, i32
  }
  func.func @transform_1(%arg0: i32, %arg1: i32) -> (i32, i32) {
    %c0_i32 = arith.constant 0 : i32
    %c0_i32_0 = arith.constant 0 : i32
    %c0_i32_1 = arith.constant 0 : i32
    return %c0_i32, %c0_i32_0 : i32, i32
  }
  func.func @transform_2(%arg0: i32, %arg1: i32) -> (i32, i32) {
    %c0_i32 = arith.constant 0 : i32
    %c0_i32_0 = arith.constant 0 : i32
    %c0_i32_1 = arith.constant 0 : i32
    return %c0_i32, %c0_i32_0 : i32, i32
  }
  func.func @transform_3(%arg0: i32, %arg1: i32) -> (i32, i32) {
    %c0_i32 = arith.constant 0 : i32
    %c0_i32_0 = arith.constant 0 : i32
    %c0_i32_1 = arith.constant 0 : i32
    return %c0_i32, %c0_i32_0 : i32, i32
  }
  func.func @transform_4(%arg0: i32, %arg1: i32) -> (i32, i32) {
    %c0_i32 = arith.constant 0 : i32
    %c0_i32_0 = arith.constant 0 : i32
    %c0_i32_1 = arith.constant 0 : i32
    return %c0_i32, %c0_i32_0 : i32, i32
  }
  func.func @transform_5(%arg0: i32, %arg1: i32) -> (i32, i32, i32) {
    %c0_i32 = arith.constant 0 : i32
    %c0_i32_0 = arith.constant 0 : i32
    return %arg0, %c0_i32, %arg1 : i32, i32, i32
  }
}

</mosaic_0001>

<bundles_post_ra>
// kernel: ffn_pallas.3
= control target key start
LH: loop header
LB: loop body
LE: loop exit
PB: predicated region body
PF: predicated region fallthrough
CT: control target
= control target key end

     0   :  { %s570_s15 = smov 0   ;;  %s572_s16 = smov 0   ;;  %s626_s0 = inlined_call_operand.vmem [shape: f32[2,4,256], index: 0, kind: input, shape index: {}]   ;;  %s627_s1 = inlined_call_operand.vmem [shape: f32[8,4], index: 1, kind: input, shape index: {}]   ;;  %s628_s2 = inlined_call_operand.vmem [shape: f32[8,1], index: 2, kind: input, shape index: {}]   ;;  %s629_s3 = inlined_call_operand.vmem [shape: f32[2,8,1], index: 3, kind: output, shape index: {0}]   ;;  %s630_s4 = inlined_call_operand.vmem [shape: f32[2,8,1], index: 4, kind: output, shape index: {1}]  }
   0x1   :  { %s574_s17 = smov 0  }
   0x2 LB: > { %s27_s18 = sadd.s32 1, %s534_s16  ;;  %p473_p0 = scmp.ge.s32.totalorder %s538_s17, 1  ;;  %s538_s17 = sphi %s574_s17, %s15_s17   ;;  %s534_s16 = sphi %s572_s16, %s632_s16   ;;  %s530_s15 = sphi %s570_s15, %s631_s15  }
   0x3   : > { %p29_p1 = scmp.ge.s32.totalorder %s27_s18, 2  ;;  %p184_p2 = scmp.lt.s32.totalorder %s538_s17, 3 }
   0x5   : > { %s634_s18 = smov (%p29_p1, %s27_s18), 0  ;;  %p185_p3 = pnand %p473_p0, %p184_p2 }
   0x6   : > { %v243_v0 = vld [vmem:[%s627_s1] sm:$0xff] (!%p185_p3)  ;;  %v540_v1 = vmov (!%p185_p3), 0   ;;  %v541_v2 = vmov (!%p185_p3), 2   ;;  %v542_v3 = vmov (!%p185_p3), 1   ;;  %v543_v4 = vmov (!%p185_p3), 3   ;;  %p218_p4 = scmp.lt.s32.totalorder (!%p185_p3), %s530_s15, 1 }
   0x7   : > { %188 = sbr.rel (%p185_p3) target bundleno = 300 (0x12c), region = 32  ;;  %510 = vset.pattern.permute.xlu0 (!%p185_p3), %v540_v1  ;;  %512 = vset.pattern.permute.xlu1 (!%p185_p3), %v541_v2  ;;  %v348_v5 = vld [vmem:[%s628_s2] sm:$0xff] (!%p185_p3)  ;;  %vm239_vm0 = vcmask (!%p185_p3), 7168   ;;  %v544_v6 = vmov (!%p185_p3), 0.0   ;;  %v250_v7 = vlaneseq (!%p185_p3) }
   0x8   : > { %246 = vperm.xlu0 (!%p185_p3), %510, %v243_v0   ;;  %297 = vperm.xlu1 (!%p185_p3), %512, %v243_v0  }
   0x9   : > { %v251_v8 = vshrl.u32 (!%p185_p3), %v250_v7, 7 }
   0xb   : > { %v252_v9 = vsub.s32 (!%p185_p3), 0, %v251_v8  ;;  %v256_v10 = vsub.s32 (!%p185_p3), 4, %v251_v8  ;;  %v276_v11 = vsub.s32 (!%p185_p3), 1, %v251_v8  ;;  %v280_v12 = vsub.s32 (!%p185_p3), 5, %v251_v8 }
   0xc   : > { %511 = vset.pattern.permute.xlu0 (!%p185_p3), %v542_v3  ;;  %513 = vset.pattern.permute.xlu1 (!%p185_p3), %v543_v4  ;;  %v302_v14 = vsub.s32 (!%p185_p3), 2, %v251_v8  ;;  %v306_v15 = vsub.s32 (!%p185_p3), 6, %v251_v8  ;;  %v328_v16 = vsub.s32 (!%p185_p3), 3, %v251_v8  ;;  %v332_v17 = vsub.s32 (!%p185_p3), 7, %v251_v8 }
   0xd   : > { %271 = vperm.xlu0 (!%p185_p3), %511, %v243_v0   ;;  %323 = vperm.xlu1 (!%p185_p3), %513, %v243_v0  }
   0xe   : > { %s636_s15 = smov (!%p218_p4, %s530_s15), 1 }
   0xf   : > { %s594_s23 = sshll.u32 %s636_s15, 3 }
  0x10   : > { %s600_s26 = scalar_lea.vmem %s629_s3, %s594_s23  ;;  %s225_s29 = scalar_lea.vmem %s626_s0, %s594_s23 }
  0x11   : > { %514 = vset.pattern.permute.xlu1 %v540_v1  ;;  %515 = vset.pattern.permute.xlu0 %v540_v1  ;;  %240 = vst.msk [vmem:[%s600_s26] sm:$0xff] %vm239_vm0, %v544_v6  ;;  %v242_v13 = vld [vmem:[%s225_s29] sm:$0xff]  ;;  %s234_s6 = scalar_lea.vmem %s630_s4, %s594_s23 }
  0x12   : > { %351 = vperm.xlu1 %514, %v348_v5   ;;  %v253_v18 = vrot.slane %v242_v13, %v252_v9  ;;  %v257_v19 = vrot.slane %v242_v13, %v256_v10  ;;  %v277_v20 = vrot.slane %v242_v13, %v276_v11  ;;  %v281_v21 = vrot.slane %v242_v13, %v280_v12 }
  0x13   : > { %v303_v22 = vrot.slane %v242_v13, %v302_v14  ;;  %v307_v23 = vrot.slane %v242_v13, %v306_v15  ;;  %v329_v26 = vrot.slane %v242_v13, %v328_v16  ;;  %v333_v27 = vrot.slane %v242_v13, %v332_v17  ;;  %241 = vst.msk [vmem:[%s234_s6] sm:$0xff] %vm239_vm0, %v544_v6 }
  0x14   : > { %v263_v28 = vrot.slane %v253_v18, %v252_v9  ;;  %v267_v29 = vrot.slane %v257_v19, %v252_v9  ;;  %v287_v30 = vrot.slane %v277_v20, %v276_v11  ;;  %v291_v31 = vrot.slane %v281_v21, %v276_v11 }
  0x15   : > { %v313_v32 = vrot.slane %v303_v22, %v302_v14  ;;  %v317_v33 = vrot.slane %v307_v23, %v302_v14  ;;  %v339_v34 = vrot.slane %v329_v26, %v328_v16  ;;  %v343_v35 = vrot.slane %v333_v27, %v328_v16 }
  0x18   : > { %v356_v59 = vld [vmem:[%s600_s26] sm:$0xff] }
  0x1a   : > { %v363_v61 = vld [vmem:[%s234_s6] sm:$0xff] }
  0x87   : > { %v247_v24 = vpop.permute.xlu0 %246  ;;  %v298_v25 = vpop.permute.xlu1 %297 }
  0x88   : > { %v268_v38 = vmul.f32 %v263_v28, %v247_v24  ;;  %v269_v39 = vmul.f32 %v267_v29, %v247_v24  ;;  %v318_v42 = vmul.f32 %v313_v32, %v298_v25  ;;  %v319_v43 = vmul.f32 %v317_v33, %v298_v25 }
  0x8c   : > { %v272_v36 = vpop.permute.xlu0 %271  ;;  %v324_v37 = vpop.permute.xlu1 %323 }
  0x8d   : > { %v292_v40 = vmul.f32 %v287_v30, %v272_v36  ;;  %v293_v41 = vmul.f32 %v291_v31, %v272_v36  ;;  %v344_v46 = vmul.f32 %v339_v34, %v324_v37  ;;  %v345_v47 = vmul.f32 %v343_v35, %v324_v37 }
  0x8f   : > { %v294_v44 = vadd.f32 %v292_v40, %v268_v38  ;;  %v295_v45 = vadd.f32 %v293_v41, %v269_v39 }
  0x91   : > { %v320_v48 = vadd.f32 %v318_v42, %v294_v44  ;;  %v321_v49 = vadd.f32 %v319_v43, %v295_v45  ;;  %v352_v50 = vpop.permute.xlu1 %351 }
  0x93   : > { %v346_v51 = vadd.f32 %v344_v46, %v320_v48  ;;  %v347_v52 = vadd.f32 %v345_v47, %v321_v49 }
  0x95   : > { %v354_v53 = vadd.f32 %v352_v50, %v346_v51  ;;  %v355_v54 = vadd.f32 %v352_v50, %v347_v52 }
  0x97   : > { %v357_v55 = vadd.f32 %v355_v54, %v354_v53  ;;  %v364_v56 = vmul.f32 %v354_v53, %v354_v53  ;;  %v365_v57 = vmul.f32 %v355_v54, %v355_v54 }
  0x99   : > { %358 = vadd.xlane.f32.xlu0 %v357_v55  ;;  %v366_v58 = vadd.f32 %v365_v57, %v364_v56 }
  0x9b   : > { %367 = vadd.xlane.f32.xlu1 %v366_v58 }
 0x126   : > { %v359_v60 = vpop.xlane.xlu0 %358 }
 0x127   : > { %v360_v62 = vadd.f32 %v359_v60, %v356_v59 }
 0x128   : > { %v368_v63 = vpop.xlane.xlu1 %367 }
 0x129   : > { %362 = vst.msk [vmem:[%s600_s26] sm:$0xff] %vm239_vm0, %v360_v62  ;;  %v369_v0 = vadd.f32 %v368_v63, %v363_v61 }
 0x12b   : > { %370 = vst.msk [vmem:[%s234_s6] sm:$0xff] %vm239_vm0, %v369_v0 }
 0x12c PF: > { %s15_s17 = sadd.s32 1, %s538_s17   ;;  %s631_s15 = smov %s534_s16 }
 0x12d   : > { %p12_p5 = scmp.ge.s32.totalorder %s15_s17, 4   ;;  %s632_s16 = smov %s634_s18 }
 0x12f   :  { %14 = sbr.rel (!%p12_p5) target bundleno = 2 (0x2), region = 78 }

// kernel: ffn_pallas.4
= control target key start
LH: loop header
LB: loop body
LE: loop exit
PB: predicated region body
PF: predicated region fallthrough
CT: control target
= control target key end

     0   :  { %s789_s21 = smov 0   ;;  %s791_s22 = smov 0   ;;  %s884_s0 = inlined_call_operand.vmem [shape: f32[2,4,256], index: 0, kind: input, shape index: {}]   ;;  %s885_s1 = inlined_call_operand.vmem [shape: f32[8,4], index: 1, kind: input, shape index: {}]   ;;  %s886_s2 = inlined_call_operand.vmem [shape: f32[8,1], index: 2, kind: input, shape index: {}]   ;;  %s887_s3 = inlined_call_operand.vmem [shape: f32[8,8], index: 3, kind: input, shape index: {}]   ;;  %s888_s4 = inlined_call_operand.vmem [shape: f32[8,1], index: 4, kind: input, shape index: {}]   ;;  %s889_s5 = inlined_call_operand.vmem [shape: f32[2,8,1], index: 5, kind: output, shape index: {0}]   ;;  %s890_s6 = inlined_call_operand.vmem [shape: f32[2,8,1], index: 6, kind: output, shape index: {1}]  }
   0x1   :  { %s793_s23 = smov 0  }
   0x2 LB: > { %s29_s24 = sadd.s32 1, %s739_s22  ;;  %p665_p0 = scmp.ge.s32.totalorder %s743_s23, 1  ;;  %s743_s23 = sphi %s793_s23, %s17_s23   ;;  %s739_s22 = sphi %s791_s22, %s892_s22   ;;  %s735_s21 = sphi %s789_s21, %s891_s21  }
   0x3   : > { %p31_p1 = scmp.ge.s32.totalorder %s29_s24, 2  ;;  %p234_p2 = scmp.lt.s32.totalorder %s743_s23, 3 }
   0x5   : > { %s894_s24 = smov (%p31_p1, %s29_s24), 0  ;;  %p235_p3 = pnand %p665_p0, %p234_p2 }
   0x6   : > { %v297_v0 = vld [vmem:[%s885_s1] sm:$0xff] (!%p235_p3)  ;;  %v745_v1 = vmov (!%p235_p3), 2   ;;  %v746_v2 = vmov (!%p235_p3), 0   ;;  %v747_v3 = vmov (!%p235_p3), 3   ;;  %v748_v4 = vmov (!%p235_p3), 1   ;;  %p272_p4 = scmp.lt.s32.totalorder (!%p235_p3), %s735_s21, 1 }
   0x7   : > { %238 = sbr.rel (%p235_p3) target bundleno = 327 (0x147), region = 40  ;;  %708 = vset.pattern.permute.xlu1 (!%p235_p3), %v745_v1  ;;  %706 = vset.pattern.permute.xlu0 (!%p235_p3), %v746_v2  ;;  %v402_v5 = vld [vmem:[%s886_s2] sm:$0xff] (!%p235_p3)  ;;  %v749_v7 = vmov (!%p235_p3), 6   ;;  %v750_v8 = vmov (!%p235_p3), 4   ;;  %v751_v9 = vmov (!%p235_p3), 5   ;;  %v752_v10 = vmov (!%p235_p3), 7  }
   0x8   : > { %351 = vperm.xlu1 (!%p235_p3), %708, %v297_v0   ;;  %300 = vperm.xlu0 (!%p235_p3), %706, %v297_v0   ;;  %v412_v6 = vld [vmem:[%s887_s3] sm:$0xff] (!%p235_p3)  ;;  %vm293_vm0 = vcmask (!%p235_p3), 7168   ;;  %v753_v12 = vmov (!%p235_p3), 0.0   ;;  %v304_v13 = vlaneseq (!%p235_p3) }
   0x9   : > { %v540_v11 = vld [vmem:[%s888_s4] sm:$0xff] (!%p235_p3) }
   0xa   : > { %v305_v14 = vshrl.u32 (!%p235_p3), %v304_v13, 7 }
   0xc   : > { %709 = vset.pattern.permute.xlu1 (!%p235_p3), %v747_v3  ;;  %707 = vset.pattern.permute.xlu0 (!%p235_p3), %v748_v4  ;;  %v306_v15 = vsub.s32 (!%p235_p3), 0, %v305_v14  ;;  %v838_v16 = vsub.s32 (!%p235_p3), 4, %v305_v14  ;;  %v330_v17 = vsub.s32 (!%p235_p3), 1, %v305_v14  ;;  %v840_v18 = vsub.s32 (!%p235_p3), 5, %v305_v14 }
   0xd   : > { %377 = vperm.xlu1 (!%p235_p3), %709, %v297_v0   ;;  %325 = vperm.xlu0 (!%p235_p3), %707, %v297_v0   ;;  %v356_v20 = vsub.s32 (!%p235_p3), 2, %v305_v14  ;;  %v842_v21 = vsub.s32 (!%p235_p3), 6, %v305_v14  ;;  %v845_v24 = vsub.s32 (!%p235_p3), 3, %v305_v14  ;;  %v847_v25 = vsub.s32 (!%p235_p3), 7, %v305_v14 }
   0xe   : > { %s896_s21 = smov (!%p272_p4, %s735_s21), 1 }
   0xf   : > { %s823_s9 = sshll.u32 %s896_s21, 3 }
  0x10   : > { %s829_s12 = scalar_lea.vmem %s889_s5, %s823_s9  ;;  %s279_s15 = scalar_lea.vmem %s884_s0, %s823_s9 }
  0x11   : > { %710 = vset.pattern.permute.xlu1 %v746_v2  ;;  %711 = vset.pattern.permute.xlu0 %v746_v2  ;;  %294 = vst.msk [vmem:[%s829_s12] sm:$0xff] %vm293_vm0, %v753_v12  ;;  %v296_v19 = vld [vmem:[%s279_s15] sm:$0xff]  ;;  %s288_s18 = scalar_lea.vmem %s890_s6, %s823_s9 }
  0x12   : > { %405 = vperm.xlu1 %710, %v402_v5   ;;  %415 = vperm.xlu0 %711, %v412_v6   ;;  %v307_v22 = vrot.slane %v296_v19, %v306_v15  ;;  %v311_v23 = vrot.slane %v296_v19, %v838_v16  ;;  %v331_v26 = vrot.slane %v296_v19, %v330_v17 }
  0x13   : > { %v335_v27 = vrot.slane %v296_v19, %v840_v18  ;;  %v357_v29 = vrot.slane %v296_v19, %v356_v20  ;;  %v361_v30 = vrot.slane %v296_v19, %v842_v21  ;;  %v383_v34 = vrot.slane %v296_v19, %v845_v24  ;;  %295 = vst.msk [vmem:[%s288_s18] sm:$0xff] %vm293_vm0, %v753_v12 }
  0x14   : > { %v317_v32 = vrot.slane %v307_v22, %v306_v15  ;;  %v321_v33 = vrot.slane %v311_v23, %v306_v15  ;;  %v387_v35 = vrot.slane %v296_v19, %v847_v25  ;;  %v341_v36 = vrot.slane %v331_v26, %v330_v17 }
  0x15   : > { %v345_v37 = vrot.slane %v335_v27, %v330_v17  ;;  %v367_v38 = vrot.slane %v357_v29, %v356_v20  ;;  %v371_v39 = vrot.slane %v361_v30, %v356_v20  ;;  %v393_v44 = vrot.slane %v383_v34, %v845_v24 }
  0x16   : > { %712 = vset.pattern.permute.xlu1 %v748_v4  ;;  %714 = vset.pattern.permute.xlu0 %v747_v3  ;;  %v397_v45 = vrot.slane %v387_v35, %v845_v24 }
  0x17   : > { %429 = vperm.xlu1 %712, %v412_v6   ;;  %461 = vperm.xlu0 %714, %v412_v6  }
  0x1b   : > { %713 = vset.pattern.permute.xlu1 %v745_v1  ;;  %717 = vset.pattern.permute.xlu0 %v749_v7 }
  0x1c   : > { %445 = vperm.xlu1 %713, %v412_v6   ;;  %509 = vperm.xlu0 %717, %v412_v6  }
  0x20   : > { %715 = vset.pattern.permute.xlu1 %v750_v8  ;;  %720 = vset.pattern.permute.xlu0 %v746_v2 }
  0x21   : > { %477 = vperm.xlu1 %715, %v412_v6  }
  0x25   : > { %716 = vset.pattern.permute.xlu1 %v751_v9 }
  0x26   : > { %493 = vperm.xlu1 %716, %v412_v6  }
  0x2a   : > { %718 = vset.pattern.permute.xlu1 %v752_v10 }
  0x2b   : > { %525 = vperm.xlu1 %718, %v412_v6  }
  0x2f   : > { %719 = vset.pattern.permute.xlu1 %v746_v2 }
  0x30   : > { %543 = vperm.xlu1 %719, %v540_v11  }
  0x87   : > { %v352_v28 = vpop.permute.xlu1 %351  ;;  %v301_v31 = vpop.permute.xlu0 %300 }
  0x88   : > { %v322_v40 = vmul.f32 %v317_v32, %v301_v31  ;;  %v323_v41 = vmul.f32 %v321_v33, %v301_v31  ;;  %v372_v48 = vmul.f32 %v367_v38, %v352_v28  ;;  %v373_v49 = vmul.f32 %v371_v39, %v352_v28 }
  0x8c   : > { %v378_v42 = vpop.permute.xlu1 %377  ;;  %v326_v43 = vpop.permute.xlu0 %325 }
  0x8d   : > { %v346_v46 = vmul.f32 %v341_v36, %v326_v43  ;;  %v347_v47 = vmul.f32 %v345_v37, %v326_v43  ;;  %v398_v52 = vmul.f32 %v393_v44, %v378_v42  ;;  %v399_v53 = vmul.f32 %v397_v45, %v378_v42 }
  0x8f   : > { %v348_v50 = vadd.f32 %v346_v46, %v322_v40  ;;  %v349_v51 = vadd.f32 %v347_v47, %v323_v41 }
  0x91   : > { %v406_v54 = vpop.permute.xlu1 %405  ;;  %v374_v55 = vadd.f32 %v372_v48, %v348_v50  ;;  %v375_v56 = vadd.f32 %v373_v49, %v349_v51  ;;  %v416_v0 = vpop.permute.xlu0 %415 }
  0x93   : > { %v400_v57 = vadd.f32 %v398_v52, %v374_v55  ;;  %v401_v58 = vadd.f32 %v399_v53, %v375_v56 }
  0x95   : > { %v408_v59 = vadd.f32 %v406_v54, %v400_v57  ;;  %v409_v60 = vadd.f32 %v406_v54, %v401_v58 }
  0x96   : > { %v430_v61 = vpop.permute.xlu1 %429  ;;  %v462_v27 = vpop.permute.xlu0 %461 }
  0x97   : > { %v410_v62 = vmax.f32 %v408_v59, 0.0  ;;  %v411_v63 = vmax.f32 %v409_v60, 0.0 }
  0x99   : > { %v421_v1 = vrot.slane %v410_v62, %v306_v15  ;;  %v425_v2 = vrot.slane %v411_v63, %v306_v15  ;;  %v435_v3 = vrot.slane %v410_v62, %v330_v17  ;;  %v439_v4 = vrot.slane %v411_v63, %v330_v17 }
  0x9a   : > { %v451_v5 = vrot.slane %v410_v62, %v356_v20  ;;  %v455_v6 = vrot.slane %v411_v63, %v356_v20  ;;  %v467_v13 = vrot.slane %v410_v62, %v845_v24  ;;  %v471_v14 = vrot.slane %v411_v63, %v845_v24 }
  0x9b   : > { %v426_v7 = vmul.f32 %v421_v1, %v416_v0  ;;  %v427_v8 = vmul.f32 %v425_v2, %v416_v0  ;;  %v440_v9 = vmul.f32 %v435_v3, %v430_v61  ;;  %v441_v10 = vmul.f32 %v439_v4, %v430_v61  ;;  %v446_v11 = vpop.permute.xlu1 %445  ;;  %v510_v39 = vpop.permute.xlu0 %509 }
  0x9c   : > { %v456_v19 = vmul.f32 %v451_v5, %v446_v11  ;;  %v457_v22 = vmul.f32 %v455_v6, %v446_v11  ;;  %v472_v29 = vmul.f32 %v467_v13, %v462_v27  ;;  %v473_v17 = vmul.f32 %v471_v14, %v462_v27 }
  0x9d   : > { %v442_v23 = vadd.f32 %v440_v9, %v426_v7  ;;  %v443_v26 = vadd.f32 %v441_v10, %v427_v8  ;;  %v483_v20 = vrot.slane %v410_v62, %v838_v16  ;;  %v487_v31 = vrot.slane %v411_v63, %v838_v16 }
  0x9e   : > { %v515_v24 = vrot.slane %v410_v62, %v842_v21  ;;  %v519_v36 = vrot.slane %v411_v63, %v842_v21  ;;  %v499_v37 = vrot.slane %v410_v62, %v840_v18  ;;  %v503_v38 = vrot.slane %v411_v63, %v840_v18 }
  0x9f   : > { %v458_v28 = vadd.f32 %v456_v19, %v442_v23  ;;  %v459_v15 = vadd.f32 %v457_v22, %v443_v26  ;;  %v531_v48 = vrot.slane %v410_v62, %v847_v25  ;;  %v535_v49 = vrot.slane %v411_v63, %v847_v25  ;;  %v548_v25 = vld [vmem:[%s829_s12] sm:$0xff] }
  0xa0   : > { %v478_v30 = vpop.permute.xlu1 %477  ;;  %v520_v45 = vmul.f32 %v515_v24, %v510_v39  ;;  %v521_v16 = vmul.f32 %v519_v36, %v510_v39  ;;  %v555_v63 = vld [vmem:[%s288_s18] sm:$0xff] }
  0xa1   : > { %v474_v32 = vadd.f32 %v472_v29, %v458_v28  ;;  %v475_v33 = vadd.f32 %v473_v17, %v459_v15  ;;  %v488_v34 = vmul.f32 %v483_v20, %v478_v30  ;;  %v489_v35 = vmul.f32 %v487_v31, %v478_v30 }
  0xa3   : > { %v490_v41 = vadd.f32 %v488_v34, %v474_v32  ;;  %v491_v42 = vadd.f32 %v489_v35, %v475_v33 }
  0xa5   : > { %v494_v40 = vpop.permute.xlu1 %493 }
  0xa6   : > { %v504_v43 = vmul.f32 %v499_v37, %v494_v40  ;;  %v505_v44 = vmul.f32 %v503_v38, %v494_v40 }
  0xa8   : > { %v506_v46 = vadd.f32 %v504_v43, %v490_v41  ;;  %v507_v47 = vadd.f32 %v505_v44, %v491_v42 }
  0xaa   : > { %v526_v50 = vpop.permute.xlu1 %525  ;;  %v522_v21 = vadd.f32 %v520_v45, %v506_v46  ;;  %v523_v51 = vadd.f32 %v521_v16, %v507_v47 }
  0xab   : > { %v536_v18 = vmul.f32 %v531_v48, %v526_v50  ;;  %v537_v52 = vmul.f32 %v535_v49, %v526_v50 }
  0xad   : > { %v538_v53 = vadd.f32 %v536_v18, %v522_v21  ;;  %v539_v54 = vadd.f32 %v537_v52, %v523_v51 }
  0xaf   : > { %v544_v55 = vpop.permute.xlu1 %543 }
  0xb0   : > { %v546_v56 = vadd.f32 %v544_v55, %v538_v53  ;;  %v547_v57 = vadd.f32 %v544_v55, %v539_v54 }
  0xb2   : > { %v549_v58 = vadd.f32 %v547_v57, %v546_v56  ;;  %v556_v59 = vmul.f32 %v546_v56, %v546_v56  ;;  %v557_v60 = vmul.f32 %v547_v57, %v547_v57 }
  0xb4   : > { %550 = vadd.xlane.f32.xlu0 %v549_v58  ;;  %v558_v61 = vadd.f32 %v557_v60, %v556_v59 }
  0xb6   : > { %559 = vadd.xlane.f32.xlu1 %v558_v61 }
 0x141   : > { %v551_v62 = vpop.xlane.xlu0 %550 }
 0x142   : > { %v552_v0 = vadd.f32 %v551_v62, %v548_v25 }
 0x143   : > { %v560_v1 = vpop.xlane.xlu1 %559 }
 0x144   : > { %554 = vst.msk [vmem:[%s829_s12] sm:$0xff] %vm293_vm0, %v552_v0  ;;  %v561_v2 = vadd.f32 %v560_v1, %v555_v63 }
 0x146   : > { %562 = vst.msk [vmem:[%s288_s18] sm:$0xff] %vm293_vm0, %v561_v2 }
 0x147 PF: > { %s17_s23 = sadd.s32 1, %s743_s23   ;;  %s891_s21 = smov %s739_s22 }
 0x148   : > { %p14_p5 = scmp.ge.s32.totalorder %s17_s23, 4   ;;  %s892_s22 = smov %s894_s24 }
 0x14a   :  { %16 = sbr.rel (!%p14_p5) target bundleno = 2 (0x2), region = 86 }

// kernel: ffn_pallas.5
= control target key start
LH: loop header
LB: loop body
LE: loop exit
PB: predicated region body
PF: predicated region fallthrough
CT: control target
= control target key end

     0   :  { %s727_s18 = smov 0   ;;  %s729_s19 = smov 0   ;;  %s807_s0 = inlined_call_operand.vmem [shape: f32[2,4,256], index: 0, kind: input, shape index: {}]   ;;  %s808_s1 = inlined_call_operand.vmem [shape: f32[8,4], index: 1, kind: input, shape index: {}]   ;;  %s809_s2 = inlined_call_operand.vmem [shape: f32[8,1], index: 2, kind: input, shape index: {}]   ;;  %s810_s3 = inlined_call_operand.vmem [shape: f32[8,8], index: 3, kind: input, shape index: {}]   ;;  %s811_s4 = inlined_call_operand.vmem [shape: f32[8,1], index: 4, kind: input, shape index: {}]   ;;  %s812_s5 = inlined_call_operand.vmem [shape: f32[2,8,256], index: 5, kind: output, shape index: {}]  }
   0x1   :  { %s731_s20 = smov 0  }
   0x2 LB: > { %s27_s21 = sadd.s32 1, %s683_s19  ;;  %p609_p0 = scmp.ge.s32.totalorder %s687_s20, 1  ;;  %s687_s20 = sphi %s731_s20, %s15_s20   ;;  %s683_s19 = sphi %s729_s19, %s814_s19   ;;  %s679_s18 = sphi %s727_s18, %s813_s18  }
   0x3   : > { %p29_p1 = scmp.ge.s32.totalorder %s27_s21, 2  ;;  %p208_p2 = scmp.lt.s32.totalorder %s687_s20, 3 }
   0x5   : > { %s816_s21 = smov (%p29_p1, %s27_s21), 0  ;;  %p209_p3 = pnand %p609_p0, %p208_p2 }
   0x6   : > { %v265_v0 = vld [vmem:[%s808_s1] sm:$0xff] (!%p209_p3)  ;;  %v689_v1 = vmov (!%p209_p3), 2   ;;  %v690_v2 = vmov (!%p209_p3), 0   ;;  %v691_v3 = vmov (!%p209_p3), 3   ;;  %v692_v4 = vmov (!%p209_p3), 1   ;;  %p245_p4 = scmp.lt.s32.totalorder (!%p209_p3), %s679_s18, 1 }
   0x7   : > { %212 = sbr.rel (%p209_p3) target bundleno = 179 (0xb3), region = 40  ;;  %652 = vset.pattern.permute.xlu1 (!%p209_p3), %v689_v1  ;;  %650 = vset.pattern.permute.xlu0 (!%p209_p3), %v690_v2  ;;  %v370_v5 = vld [vmem:[%s809_s2] sm:$0xff] (!%p209_p3)  ;;  %v693_v7 = vmov (!%p209_p3), 6   ;;  %v694_v8 = vmov (!%p209_p3), 4   ;;  %v695_v9 = vmov (!%p209_p3), 5   ;;  %v696_v10 = vmov (!%p209_p3), 7  }
   0x8   : > { %319 = vperm.xlu1 (!%p209_p3), %652, %v265_v0   ;;  %268 = vperm.xlu0 (!%p209_p3), %650, %v265_v0   ;;  %v380_v6 = vld [vmem:[%s810_s3] sm:$0xff] (!%p209_p3)  ;;  %v272_v12 = vlaneseq (!%p209_p3) }
   0x9   : > { %v508_v11 = vld [vmem:[%s811_s4] sm:$0xff] (!%p209_p3) }
   0xa   : > { %v273_v13 = vshrl.u32 (!%p209_p3), %v272_v12, 7 }
   0xc   : > { %653 = vset.pattern.permute.xlu1 (!%p209_p3), %v691_v3  ;;  %651 = vset.pattern.permute.xlu0 (!%p209_p3), %v692_v4  ;;  %v274_v14 = vsub.s32 (!%p209_p3), 0, %v273_v13  ;;  %v767_v15 = vsub.s32 (!%p209_p3), 4, %v273_v13  ;;  %v298_v16 = vsub.s32 (!%p209_p3), 1, %v273_v13  ;;  %v769_v17 = vsub.s32 (!%p209_p3), 5, %v273_v13 }
   0xd   : > { %345 = vperm.xlu1 (!%p209_p3), %653, %v265_v0   ;;  %293 = vperm.xlu0 (!%p209_p3), %651, %v265_v0   ;;  %v324_v19 = vsub.s32 (!%p209_p3), 2, %v273_v13  ;;  %v771_v20 = vsub.s32 (!%p209_p3), 6, %v273_v13  ;;  %v774_v23 = vsub.s32 (!%p209_p3), 3, %v273_v13  ;;  %v776_v24 = vsub.s32 (!%p209_p3), 7, %v273_v13 }
   0xe   : > { %s818_s18 = smov (!%p245_p4, %s679_s18), 1 }
   0xf   : > { %s616_s30 = sshll.u32 %s818_s18, 3  ;;  %s617_s9 = sshll.u32 %s818_s18, 4 }
  0x10   : > { %s252_s8 = scalar_lea.vmem %s807_s0, %s616_s30  ;;  %s262_s12 = scalar_lea.vmem %s812_s5, %s617_s9 }
  0x11   : > { %654 = vset.pattern.permute.xlu1 %v690_v2  ;;  %655 = vset.pattern.permute.xlu0 %v690_v2  ;;  %v264_v18 = vld [vmem:[%s252_s8] sm:$0xff] }
  0x12   : > { %373 = vperm.xlu1 %654, %v370_v5   ;;  %383 = vperm.xlu0 %655, %v380_v6   ;;  %v275_v21 = vrot.slane %v264_v18, %v274_v14  ;;  %v279_v22 = vrot.slane %v264_v18, %v767_v15  ;;  %v299_v25 = vrot.slane %v264_v18, %v298_v16 }
  0x13   : > { %v303_v26 = vrot.slane %v264_v18, %v769_v17  ;;  %v325_v28 = vrot.slane %v264_v18, %v324_v19  ;;  %v329_v29 = vrot.slane %v264_v18, %v771_v20  ;;  %v351_v33 = vrot.slane %v264_v18, %v774_v23 }
  0x14   : > { %v285_v31 = vrot.slane %v275_v21, %v274_v14  ;;  %v289_v32 = vrot.slane %v279_v22, %v274_v14  ;;  %v355_v34 = vrot.slane %v264_v18, %v776_v24  ;;  %v309_v35 = vrot.slane %v299_v25, %v298_v16 }
  0x15   : > { %v313_v36 = vrot.slane %v303_v26, %v298_v16  ;;  %v335_v37 = vrot.slane %v325_v28, %v324_v19  ;;  %v339_v38 = vrot.slane %v329_v29, %v324_v19  ;;  %v361_v43 = vrot.slane %v351_v33, %v774_v23 }
  0x16   : > { %656 = vset.pattern.permute.xlu1 %v692_v4  ;;  %658 = vset.pattern.permute.xlu0 %v691_v3  ;;  %v365_v44 = vrot.slane %v355_v34, %v774_v23 }
  0x17   : > { %397 = vperm.xlu1 %656, %v380_v6   ;;  %429 = vperm.xlu0 %658, %v380_v6  }
  0x1b   : > { %657 = vset.pattern.permute.xlu1 %v689_v1  ;;  %661 = vset.pattern.permute.xlu0 %v693_v7 }
  0x1c   : > { %413 = vperm.xlu1 %657, %v380_v6   ;;  %477 = vperm.xlu0 %661, %v380_v6  }
  0x20   : > { %659 = vset.pattern.permute.xlu1 %v694_v8  ;;  %664 = vset.pattern.permute.xlu0 %v690_v2 }
  0x21   : > { %445 = vperm.xlu1 %659, %v380_v6  }
  0x25   : > { %660 = vset.pattern.permute.xlu1 %v695_v9 }
  0x26   : > { %461 = vperm.xlu1 %660, %v380_v6  }
  0x2a   : > { %662 = vset.pattern.permute.xlu1 %v696_v10 }
  0x2b   : > { %493 = vperm.xlu1 %662, %v380_v6  }
  0x2f   : > { %663 = vset.pattern.permute.xlu1 %v690_v2 }
  0x30   : > { %511 = vperm.xlu1 %663, %v508_v11  }
  0x87   : > { %v320_v27 = vpop.permute.xlu1 %319  ;;  %v269_v30 = vpop.permute.xlu0 %268 }
  0x88   : > { %v290_v39 = vmul.f32 %v285_v31, %v269_v30  ;;  %v291_v40 = vmul.f32 %v289_v32, %v269_v30  ;;  %v340_v47 = vmul.f32 %v335_v37, %v320_v27  ;;  %v341_v48 = vmul.f32 %v339_v38, %v320_v27 }
  0x8c   : > { %v346_v41 = vpop.permute.xlu1 %345  ;;  %v294_v42 = vpop.permute.xlu0 %293 }
  0x8d   : > { %v314_v45 = vmul.f32 %v309_v35, %v294_v42  ;;  %v315_v46 = vmul.f32 %v313_v36, %v294_v42  ;;  %v366_v51 = vmul.f32 %v361_v43, %v346_v41  ;;  %v367_v52 = vmul.f32 %v365_v44, %v346_v41 }
  0x8f   : > { %v316_v49 = vadd.f32 %v314_v45, %v290_v39  ;;  %v317_v50 = vadd.f32 %v315_v46, %v291_v40 }
  0x91   : > { %v374_v53 = vpop.permute.xlu1 %373  ;;  %v342_v54 = vadd.f32 %v340_v47, %v316_v49  ;;  %v343_v55 = vadd.f32 %v341_v48, %v317_v50  ;;  %v384_v63 = vpop.permute.xlu0 %383 }
  0x93   : > { %v368_v56 = vadd.f32 %v366_v51, %v342_v54  ;;  %v369_v57 = vadd.f32 %v367_v52, %v343_v55 }
  0x95   : > { %v376_v58 = vadd.f32 %v374_v53, %v368_v56  ;;  %v377_v59 = vadd.f32 %v374_v53, %v369_v57 }
  0x96   : > { %v398_v60 = vpop.permute.xlu1 %397  ;;  %v430_v25 = vpop.permute.xlu0 %429 }
  0x97   : > { %v378_v61 = vmax.f32 %v376_v58, 0.0  ;;  %v379_v62 = vmax.f32 %v377_v59, 0.0 }
  0x99   : > { %v389_v0 = vrot.slane %v378_v61, %v274_v14  ;;  %v393_v1 = vrot.slane %v379_v62, %v274_v14  ;;  %v403_v2 = vrot.slane %v378_v61, %v298_v16  ;;  %v407_v3 = vrot.slane %v379_v62, %v298_v16 }
  0x9a   : > { %v419_v4 = vrot.slane %v378_v61, %v324_v19  ;;  %v423_v5 = vrot.slane %v379_v62, %v324_v19  ;;  %v435_v11 = vrot.slane %v378_v61, %v774_v23  ;;  %v439_v12 = vrot.slane %v379_v62, %v774_v23 }
  0x9b   : > { %v394_v6 = vmul.f32 %v389_v0, %v384_v63  ;;  %v395_v7 = vmul.f32 %v393_v1, %v384_v63  ;;  %v408_v8 = vmul.f32 %v403_v2, %v398_v60  ;;  %v409_v9 = vmul.f32 %v407_v3, %v398_v60  ;;  %v414_v10 = vpop.permute.xlu1 %413  ;;  %v478_v37 = vpop.permute.xlu0 %477 }
  0x9c   : > { %v424_v13 = vmul.f32 %v419_v4, %v414_v10  ;;  %v425_v18 = vmul.f32 %v423_v5, %v414_v10  ;;  %v440_v27 = vmul.f32 %v435_v11, %v430_v25  ;;  %v441_v16 = vmul.f32 %v439_v12, %v430_v25 }
  0x9d   : > { %v410_v21 = vadd.f32 %v408_v8, %v394_v6  ;;  %v411_v22 = vadd.f32 %v409_v9, %v395_v7  ;;  %v451_v19 = vrot.slane %v378_v61, %v767_v15  ;;  %v455_v29 = vrot.slane %v379_v62, %v767_v15 }
  0x9e   : > { %v483_v23 = vrot.slane %v378_v61, %v771_v20  ;;  %v487_v34 = vrot.slane %v379_v62, %v771_v20  ;;  %v467_v35 = vrot.slane %v378_v61, %v769_v17  ;;  %v471_v36 = vrot.slane %v379_v62, %v769_v17 }
  0x9f   : > { %v426_v26 = vadd.f32 %v424_v13, %v410_v21  ;;  %v427_v14 = vadd.f32 %v425_v18, %v411_v22  ;;  %v499_v46 = vrot.slane %v378_v61, %v776_v24  ;;  %v503_v47 = vrot.slane %v379_v62, %v776_v24 }
  0xa0   : > { %v446_v28 = vpop.permute.xlu1 %445  ;;  %v488_v15 = vmul.f32 %v483_v23, %v478_v37  ;;  %v489_v43 = vmul.f32 %v487_v34, %v478_v37 }
  0xa1   : > { %v442_v30 = vadd.f32 %v440_v27, %v426_v26  ;;  %v443_v31 = vadd.f32 %v441_v16, %v427_v14  ;;  %v456_v32 = vmul.f32 %v451_v19, %v446_v28  ;;  %v457_v33 = vmul.f32 %v455_v29, %v446_v28 }
  0xa3   : > { %v458_v39 = vadd.f32 %v456_v32, %v442_v30  ;;  %v459_v40 = vadd.f32 %v457_v33, %v443_v31 }
  0xa5   : > { %v462_v38 = vpop.permute.xlu1 %461 }
  0xa6   : > { %v472_v41 = vmul.f32 %v467_v35, %v462_v38  ;;  %v473_v42 = vmul.f32 %v471_v36, %v462_v38 }
  0xa8   : > { %v474_v44 = vadd.f32 %v472_v41, %v458_v39  ;;  %v475_v45 = vadd.f32 %v473_v42, %v459_v40 }
  0xaa   : > { %v494_v20 = vpop.permute.xlu1 %493  ;;  %v490_v48 = vadd.f32 %v488_v15, %v474_v44  ;;  %v491_v49 = vadd.f32 %v489_v43, %v475_v45 }
  0xab   : > { %v504_v50 = vmul.f32 %v499_v46, %v494_v20  ;;  %v505_v17 = vmul.f32 %v503_v47, %v494_v20 }
  0xad   : > { %v506_v51 = vadd.f32 %v504_v50, %v490_v48  ;;  %v507_v52 = vadd.f32 %v505_v17, %v491_v49 }
  0xaf   : > { %v512_v53 = vpop.permute.xlu1 %511 }
  0xb0   : > { %v514_v54 = vadd.f32 %v512_v53, %v506_v51  ;;  %v515_v55 = vadd.f32 %v512_v53, %v507_v52 }
  0xb2   : > { %516 = vst [vmem:[%s262_s12] sm:$0xff] %v514_v54  ;;  %517 = vst [vmem:[%s262_s12 + $0x8] sm:$0xff] %v515_v55 }
  0xb3 PF: > { %s15_s20 = sadd.s32 1, %s687_s20   ;;  %s813_s18 = smov %s683_s19 }
  0xb4   : > { %p12_p5 = scmp.ge.s32.totalorder %s15_s20, 4   ;;  %s814_s19 = smov %s816_s21 }
  0xb6   :  { %14 = sbr.rel (!%p12_p5) target bundleno = 2 (0x2), region = 70 }

</bundles_post_ra>
